<compile_context>
chip_gen: v7x
topology: tpu7x:2x2x1
jax: 0.10.0
libtpu: 0.0.40
codegen_flags: <defaults>
</compile_context>

<pallas_src>
import functools

import jax
import jax.numpy as jnp
from jax.experimental import pallas as pl
from jax.experimental.pallas import tpu as pltpu


def _round_up(x, m):
    return ((x + m - 1) // m) * m


def _focal_loss_kernel(logits_ref, targets_ref, out_ref, acc_ref,
                       *, alpha, gamma, n_rows, tile_n, steps_per_core):
    c = pl.program_id(0)          # core-split axis ("parallel")
    i = pl.program_id(1)          # reduction axis ("arbitrary")

    @pl.when(i == 0)
    def _():
        acc_ref[...] = jnp.zeros_like(acc_ref)

    x = logits_ref[...].astype(jnp.float32)            # (tile_n, C)
    t = targets_ref[...]                               # (tile_n, 1) int32

    # Stable softmax stats (exp computed once, reused for pt).
    m = jnp.max(x, axis=-1, keepdims=True)             # (tile_n, 1)
    e = jnp.exp(x - m)                                  # (tile_n, C)  EUP
    sum_e = jnp.sum(e, axis=-1, keepdims=True)          # (tile_n, 1)

    col = jax.lax.broadcasted_iota(jnp.int32, x.shape, 1)
    is_t = col == t
    tgt_x = jnp.sum(jnp.where(is_t, x, 0.0), axis=-1, keepdims=True)
    tgt_e = jnp.sum(jnp.where(is_t, e, 0.0), axis=-1, keepdims=True)

    # cross_entropy(reduction='none') = logsumexp(x) - x[target]
    bce = jnp.log(sum_e) - (tgt_x - m)                  # (tile_n, 1)

    # pt = exp(-bce) = e[target] / sum_e   (approx reciprocal -> EUP slot)
    pt = tgt_e * pl.reciprocal(sum_e, approx=True)
    u = jnp.maximum(1.0 - pt, 0.0)                      # clamp: no negative base

    # focal weight: integer gamma -> repeated VPU multiplies, else safe pow.
    g = float(gamma)
    if g == int(g) and 0 <= int(g) <= 8:
        w = jnp.ones_like(u)
        for _ in range(int(g)):
            w = w * u
    else:
        w = u ** g
    f_loss = alpha * w * bce                            # (tile_n, 1)

    # Mask padding rows (wrapper pads N up to the tiled extent).
    block_idx = c * steps_per_core + i
    row = jax.lax.broadcasted_iota(jnp.int32, (tile_n, 1), 0)
    valid = (block_idx * tile_n + row) < n_rows
    f_loss = jnp.where(valid, f_loss, 0.0)

    acc_ref[...] = acc_ref[...] + f_loss                # VPU add, no reduce

    @pl.when(i == steps_per_core - 1)
    def _():
        total = jnp.sum(acc_ref[...])                   # one epilogue reduce
        # Lane-dense (8,128) output block per core; wrapper reads [0, 0].
        out_ref[...] = jnp.full((8, 128), total, dtype=jnp.float32)


def _pick_tile_n(n_per_core, C):
    """Largest multiple-of-8 row tile keeping the double-buffered logits
    (+ lane-padded targets) block comfortably inside the scoped VMEM budget."""
    lane_c = max(C, 128)                    # lanes pad to 128 in VMEM
    budget = 4 * 1024 * 1024                # bytes for logits double-buffer
    t = budget // (2 * lane_c * 4)
    t = int(max(8, min(2048, (t // 8) * 8)))
    t = min(t, _round_up(max(n_per_core, 1), 8))
    return max(t, 8)


def focal_loss(logits, targets, *, alpha=1.0, gamma=2.0, num_cores=2):
    """Focal loss, reduce=True (scalar mean). logits: [N, C], targets: [N]."""
    N, C = logits.shape
    n_per_core = -(-N // num_cores)
    tile_n = _pick_tile_n(n_per_core, C)
    steps_per_core = -(-n_per_core // tile_n)
    n_pad = num_cores * steps_per_core * tile_n

    pad = n_pad - N
    logits_p = jnp.pad(logits.astype(jnp.float32), ((0, pad), (0, 0)))
    targets_p = jnp.pad(targets.astype(jnp.int32), ((0, pad),)).reshape(n_pad, 1)

    kernel = functools.partial(
        _focal_loss_kernel, alpha=float(alpha), gamma=float(gamma),
        n_rows=N, tile_n=tile_n, steps_per_core=steps_per_core)

    out = pl.pallas_call(
        kernel,
        out_shape=jax.ShapeDtypeStruct((num_cores * 8, 128), jnp.float32),
        grid_spec=pltpu.PrefetchScalarGridSpec(
            num_scalar_prefetch=0,
            grid=(num_cores, steps_per_core),
            in_specs=[
                pl.BlockSpec((tile_n, C), lambda c, i: (c * steps_per_core + i, 0)),
                pl.BlockSpec((tile_n, 1), lambda c, i: (c * steps_per_core + i, 0)),
            ],
            out_specs=pl.BlockSpec((8, 128), lambda c, i: (c, 0)),
            scratch_shapes=[pltpu.VMEM((tile_n, 1), jnp.float32)],
        ),
        compiler_params=pltpu.CompilerParams(
            dimension_semantics=("parallel", "arbitrary"),
            vmem_limit_bytes=32 * 1024 * 1024),
        cost_estimate=pl.CostEstimate(
            flops=8 * N * C,
            transcendentals=N * C + 4 * N,
            bytes_accessed=N * C * 4 + N * 4 + num_cores * 8 * 128 * 4),
    )(logits_p, targets_p)

    partials = out[0::8, 0]                 # one partial sum per core
    return jnp.sum(partials) / N


def _focal_loss_ref(logits, targets, alpha=1.0, gamma=2.0):
    """Pure-JAX reference mirroring the PyTorch module (reduce=True path)."""
    logp = jax.nn.log_softmax(logits, axis=-1)
    bce = -jnp.take_along_axis(logp, targets[:, None].astype(jnp.int32),
                               axis=-1)[:, 0]
    pt = jnp.exp(-bce)
    return jnp.mean(alpha * (1.0 - pt) ** gamma * bce)


if __name__ == "__main__":
    key = jax.random.PRNGKey(0)
    k1, k2, k3, k4 = jax.random.split(key, 4)

    # Case 1: even batch, small class count.
    N, C = 16, 32
    logits = jax.random.normal(k1, (N, C), dtype=jnp.float32)
    targets = jax.random.randint(k2, (N,), 0, C, dtype=jnp.int32)
    out = jax.block_until_ready(focal_loss(logits, targets, alpha=1.0, gamma=2.0))
    ref = _focal_loss_ref(logits, targets, alpha=1.0, gamma=2.0)
    assert jnp.allclose(out, ref, rtol=1e-3, atol=1e-5), (out, ref)

    # Case 2: ragged batch (exercises the row-validity mask / padding path).
    N2, C2 = 13, 32
    logits2 = jax.random.normal(k3, (N2, C2), dtype=jnp.float32)
    targets2 = jax.random.randint(k4, (N2,), 0, C2, dtype=jnp.int32)
    out2 = jax.block_until_ready(focal_loss(logits2, targets2, alpha=1.0, gamma=2.0))
    ref2 = _focal_loss_ref(logits2, targets2, alpha=1.0, gamma=2.0)
    assert jnp.allclose(out2, ref2, rtol=1e-3, atol=1e-5), (out2, ref2)

    print("KERNEL_OK")
</pallas_src>

<mosaic_0001>
module attributes {stable_mosaic.version = 11 : i64} {
  func.func @_focal_loss_kernel(%arg0: i32, %arg1: i32, %arg2: memref<8x32xf32, #tpu.memory_space<vmem>>, %arg3: memref<8x1xi32, #tpu.memory_space<vmem>>, %arg4: memref<8x128xf32, #tpu.memory_space<vmem>>, %arg5: memref<8x1xf32, #tpu.memory_space<vmem>>) attributes {dimension_semantics = [#tpu.dimension_semantics<parallel>, #tpu.dimension_semantics<arbitrary>], iteration_bounds = array<i64: 2, 1>, scalar_prefetch = 0 : i64, scratch_operands = 1 : i64, tpu.core_type = #tpu.core_type<tc>, window_params = [{transform_indices = @transform_0, window_bounds = array<i64: 8, 32>}, {transform_indices = @transform_1, window_bounds = array<i64: 8, 1>}, {transform_indices = @transform_2, window_bounds = array<i64: 8, 128>}]} {
    %c0_i32 = arith.constant 0 : i32
    %0 = arith.cmpi eq, %arg1, %c0_i32 : i32
    %1 = arith.extui %0 : i1 to i32
    %c0_i32_0 = arith.constant 0 : i32
    %2 = arith.cmpi ne, %1, %c0_i32_0 : i32
    scf.if %2 {
      %cst_20 = arith.constant 0.000000e+00 : f32
      %54 = vector.broadcast %cst_20 : f32 to vector<8x1xf32>
      %c0_21 = arith.constant 0 : index
      %c0_22 = arith.constant 0 : index
      %55 = vector.load %arg5[%c0_21, %c0_22] : memref<8x1xf32, #tpu.memory_space<vmem>>, vector<8x1xf32>
      tpu.vector_store %arg5[%c0_21, %c0_22], %54 {strides = array<i32>} : memref<8x1xf32, #tpu.memory_space<vmem>>, vector<8x1xf32>,
    } else {
    }
    %c0 = arith.constant 0 : index
    %c0_1 = arith.constant 0 : index
    %3 = vector.load %arg2[%c0, %c0_1] : memref<8x32xf32, #tpu.memory_space<vmem>>, vector<8x32xf32>
    %c0_2 = arith.constant 0 : index
    %c0_3 = arith.constant 0 : index
    %4 = vector.load %arg3[%c0_2, %c0_3] : memref<8x1xi32, #tpu.memory_space<vmem>>, vector<8x1xi32>
    %cst = arith.constant dense<0xFF800000> : vector<8xf32>
    %5 = vector.multi_reduction <maximumf>, %3, %cst [1] : vector<8x32xf32> to vector<8xf32>
    %6 = vector.shape_cast %5 : vector<8xf32> to vector<8x1xf32>
    %7 = vector.broadcast %6 : vector<8x1xf32> to vector<8x32xf32>
    %8 = arith.subf %3, %7 : vector<8x32xf32>
    %9 = math.exp %8 : vector<8x32xf32>
    %cst_4 = arith.constant dense<0.000000e+00> : vector<8xf32>
    %10 = vector.multi_reduction <add>, %9, %cst_4 [1] : vector<8x32xf32> to vector<8xf32>
    %11 = vector.shape_cast %10 : vector<8xf32> to vector<8x1xf32>
    %12 = tpu.iota {dimensions = array<i32: 1>} : vector<8x32xi32>
    %13 = vector.broadcast %4 : vector<8x1xi32> to vector<8x32xi32>
    %14 = arith.cmpi eq, %12, %13 : vector<8x32xi32>
    %cst_5 = arith.constant 0.000000e+00 : f32
    %15 = vector.broadcast %cst_5 : f32 to vector<8x32xf32>
    %16 = arith.select %14, %3, %15 : vector<8x32xi1>, vector<8x32xf32>
    %cst_6 = arith.constant dense<0.000000e+00> : vector<8xf32>
    %17 = vector.multi_reduction <add>, %16, %cst_6 [1] : vector<8x32xf32> to vector<8xf32>
    %18 = vector.shape_cast %17 : vector<8xf32> to vector<8x1xf32>
    %cst_7 = arith.constant 0.000000e+00 : f32
    %19 = vector.broadcast %cst_7 : f32 to vector<8x32xf32>
    %20 = arith.select %14, %9, %19 : vector<8x32xi1>, vector<8x32xf32>
    %cst_8 = arith.constant dense<0.000000e+00> : vector<8xf32>
    %21 = vector.multi_reduction <add>, %20, %cst_8 [1] : vector<8x32xf32> to vector<8xf32>
    %22 = vector.shape_cast %21 : vector<8xf32> to vector<8x1xf32>
    %23 = math.log %11 : vector<8x1xf32>
    %24 = arith.subf %18, %6 : vector<8x1xf32>
    %25 = arith.subf %23, %24 : vector<8x1xf32>
    %26 = tpu.reciprocal %11 {approx = true} : vector<8x1xf32> -> vector<8x1xf32>
    %27 = arith.mulf %22, %26 : vector<8x1xf32>
    %cst_9 = arith.constant 1.000000e+00 : f32
    %28 = vector.broadcast %cst_9 : f32 to vector<8x1xf32>
    %29 = arith.subf %28, %27 : vector<8x1xf32>
    %cst_10 = arith.constant 0.000000e+00 : f32
    %30 = vector.broadcast %cst_10 : f32 to vector<8x1xf32>
    %31 = arith.maximumf %29, %30 : vector<8x1xf32>
    %cst_11 = arith.constant 1.000000e+00 : f32
    %32 = vector.broadcast %cst_11 : f32 to vector<8x1xf32>
    %33 = arith.mulf %32, %31 : vector<8x1xf32>
    %34 = arith.mulf %33, %31 : vector<8x1xf32>
    %cst_12 = arith.constant 1.000000e+00 : f32
    %35 = vector.broadcast %cst_12 : f32 to vector<8x1xf32>
    %36 = arith.mulf %35, %34 : vector<8x1xf32>
    %37 = arith.mulf %36, %25 : vector<8x1xf32>
    %c1_i32 = arith.constant 1 : i32
    %38 = arith.muli %arg0, %c1_i32 : i32
    %39 = arith.addi %38, %arg1 : i32
    %40 = tpu.iota {dimensions = array<i32: 0>} : vector<8x1xi32>
    %c8_i32 = arith.constant 8 : i32
    %41 = arith.muli %39, %c8_i32 : i32
    %42 = vector.broadcast %41 : i32 to vector<8x1xi32>
    %43 = arith.addi %42, %40 : vector<8x1xi32>
    %c16_i32 = arith.constant 16 : i32
    %44 = vector.broadcast %c16_i32 : i32 to vector<8x1xi32>
    %45 = arith.cmpi slt, %43, %44 : vector<8x1xi32>
    %cst_13 = arith.constant 0.000000e+00 : f32
    %46 = vector.broadcast %cst_13 : f32 to vector<8x1xf32>
    %47 = arith.select %45, %37, %46 : vector<8x1xi1>, vector<8x1xf32>
    %c0_14 = arith.constant 0 : index
    %c0_15 = arith.constant 0 : index
    %48 = vector.load %arg5[%c0_14, %c0_15] : memref<8x1xf32, #tpu.memory_space<vmem>>, vector<8x1xf32>
    %49 = arith.addf %48, %47 : vector<8x1xf32>
    %c0_16 = arith.constant 0 : index
    %c0_17 = arith.constant 0 : index
    %50 = vector.load %arg5[%c0_16, %c0_17] : memref<8x1xf32, #tpu.memory_space<vmem>>, vector<8x1xf32>
    tpu.vector_store %arg5[%c0_16, %c0_17], %49 {strides = array<i32>} : memref<8x1xf32, #tpu.memory_space<vmem>>, vector<8x1xf32>,
    %c0_i32_18 = arith.constant 0 : i32
    %51 = arith.cmpi eq, %arg1, %c0_i32_18 : i32
    %52 = arith.extui %51 : i1 to i32
    %c0_i32_19 = arith.constant 0 : i32
    %53 = arith.cmpi ne, %52, %c0_i32_19 : i32
    scf.if %53 {
      %c0_20 = arith.constant 0 : index
      %c0_21 = arith.constant 0 : index
      %54 = vector.load %arg5[%c0_20, %c0_21] : memref<8x1xf32, #tpu.memory_space<vmem>>, vector<8x1xf32>
      %55 = vector.shape_cast %54 : vector<8x1xf32> to vector<1x8x1xf32>
      %cst_22 = arith.constant dense<0.000000e+00> : vector<1xf32>
      %56 = vector.multi_reduction <add>, %55, %cst_22 [1, 2] : vector<1x8x1xf32> to vector<1xf32>
      %57 = vector.shape_cast %56 : vector<1xf32> to vector<1x1x1xf32>
      %58 = vector.extract %57[0, 0, 0] : f32 from vector<1x1x1xf32>
      %59 = vector.broadcast %58 : f32 to vector<8x128xf32>
      %c0_23 = arith.constant 0 : index
      %c0_24 = arith.constant 0 : index
      %60 = vector.load %arg4[%c0_23, %c0_24] : memref<8x128xf32, #tpu.memory_space<vmem>>, vector<8x128xf32>
      tpu.vector_store %arg4[%c0_23, %c0_24], %59 {strides = array<i32>} : memref<8x128xf32, #tpu.memory_space<vmem>>, vector<8x128xf32>,
    } else {
    }
    return
  }
  func.func @transform_0(%arg0: i32, %arg1: i32) -> (i32, i32) {
    %c1_i32 = arith.constant 1 : i32
    %0 = arith.muli %arg0, %c1_i32 : i32
    %1 = arith.addi %0, %arg1 : i32
    %c0_i32 = arith.constant 0 : i32
    %c0_i32_0 = arith.constant 0 : i32
    return %1, %c0_i32 : i32, i32
  }
  func.func @transform_1(%arg0: i32, %arg1: i32) -> (i32, i32) {
    %c1_i32 = arith.constant 1 : i32
    %0 = arith.muli %arg0, %c1_i32 : i32
    %1 = arith.addi %0, %arg1 : i32
    %c0_i32 = arith.constant 0 : i32
    %c0_i32_0 = arith.constant 0 : i32
    return %1, %c0_i32 : i32, i32
  }
  func.func @transform_2(%arg0: i32, %arg1: i32) -> (i32, i32) {
    %c0_i32 = arith.constant 0 : i32
    %c0_i32_0 = arith.constant 0 : i32
    return %arg0, %c0_i32 : i32, i32
  }
}

</mosaic_0001>

<bundles_post_ra>
// kernel: tpu_custom_call.1
= control target key start
LH: loop header
LB: loop body
LE: loop exit
PB: predicated region body
PF: predicated region fallthrough
CT: control target
= control target key end

     0   :  { %7 = vsyncpa [#allocation4], 0  ;;  %s645_s0 = inlined_call_operand.vmem [shape: f32[16,32], index: 0, kind: input, shape index: {}]   ;;  %s646_s1 = inlined_call_operand.vmem [shape: s32[16,1], index: 1, kind: input, shape index: {}]   ;;  %s647_s2 = inlined_call_operand.hbm [shape: f32[16,128], index: 2, kind: output, shape index: {}]  }
   0x1   :  { %9 = vsyncpa [#allocation4 + $0x1], 0  ;;  %s522_s9 = smov 0   ;;  %s524_s10 = smov 0  }
   0x2   :  { %s526_s11 = smov 0   ;;  %s528_s12 = smov 0  }
   0x3   :  { %s530_s13 = smov 0   ;;  %s532_s14 = smov 0  }
   0x4 LB: > { %s345_s15 = sadd.s32 4294967295, %s502_s14   ;;  %s346_s16 = sadd.s32 4294967294, %s502_s14   ;;  %s502_s14 = sphi %s532_s14, %s15_s14   ;;  %s498_s13 = sphi %s530_s13, %s654_s13   ;;  %s494_s12 = sphi %s528_s12, %s653_s12   ;;  %s490_s11 = sphi %s526_s11, %s652_s11   ;;  %s486_s10 = sphi %s524_s10, %s651_s10   ;;  %s482_s9 = sphi %s522_s9, %s650_s9  }
   0x5   : > { %s27_s17 = sadd.s32 1, %s498_s13  ;;  %s90_s18 = sadd.s32 1, %s490_s11 }
   0x6   : > { %p29_p0 = scmp.ge.s32.totalorder %s27_s17, 2  ;;  %p100_p1 = scmp.ne.s32.totalorder %s490_s11, %s486_s10 }
   0x7   : > { %p101_p2 = scmp.eq.s32.totalorder %s345_s15, 1  ;;  %p106_p3 = scmp.ne.s32.totalorder %s486_s10, %s482_s9 }
   0x8   : > { %s656_s17 = smov (%p29_p0, %s27_s17), 0  ;;  %p107_p5 = scmp.eq.s32.totalorder %s346_s16, 1 }
   0x9   : > { %p562_p4 = por %p101_p2, %p100_p1  ;;  %s87_s20 = ssub.s32 %s498_s13, %s656_s17 }
   0xa   : > { %p349_p6 = scmp.ge.s32.totalorder %s502_s14, 1  ;;  %p88_p7 = scmp.eq.s32.totalorder %s87_s20, 0 }
   0xb   : > { %p569_p8 = por %p107_p5, %p106_p3  ;;  %p143_p9 = scmp.lt.s32.totalorder %s502_s14, 3 }
   0xc   : > { %s575_s22 = scalar_select %p88_p7, %s490_s11, %s90_s18  }
   0xd   : > { %p144_p10 = pnand %p349_p6, %p143_p9 }
   0xe   : > { %p171_p11 = scmp.lt.s32.totalorder (!%p144_p10), %s494_s12, 1  ;;  %v504_v0 = vmov (!%p144_p10), 0   ;;  %vm190_vm0 = vcmask (!%p144_p10), 261120   ;;  %v200_v7 = vlaneseq (!%p144_p10)  ;;  %vm186_vm2 = vcmask (!%p144_p10), 7168   ;;  %s353_s3 = sshll.u32 (!%p144_p10), %s494_s12, 3 }
   0xf   : > { %147 = sbr.rel (%p144_p10) target bundleno = 581 (0x245), region = 28  ;;  %417 = vset.pattern.permute.xlu0 (!%p144_p10), %v504_v0  ;;  %v505_v16 = vmov (!%p144_p10), 0.0   ;;  %v228_v23 = vstv (!%p144_p10), %s353_s3  ;;  %s167_s4 = sand.u32 (!%p144_p10), 1, %s486_s10  }
  0x10   : > { %v201_v8 = vand.u32 (!%p144_p10), 127, %v200_v7  ;;  %187 = vst.msk [vmem:[#allocation2] sm:$0xff] (!%p144_p10), %vm186_vm2, %v505_v16  ;;  %v226_v21 = vshrl.u32 (!%p144_p10), %v200_v7, 7  ;;  %s350_s5 = sshll.u32 (!%p144_p10), %s167_s4, 3  ;;  %s355_s8 = sshll.u32 (!%p144_p10), %s494_s12, 7 }
  0x11   : > { %s169_s6 = scalar_lea.vmem (!%p144_p10), [#allocation3], %s350_s5  ;;  %s600_s20 = scalar_lea.hbm (!%p144_p10), %s647_s2, %s355_s8 }
  0x12   : > { %v229_v27 = vadd.s32 (!%p144_p10), %v228_v23, %v226_v21  ;;  %s266_s7 = sshll.u32 (!%p144_p10), %s169_s6, 4  ;;  %s595_s7 = int_to_ptr.vmem [resolvable:$true] %s266_s7 }
  0x14   : > { %vm230_vm3 = vcmp.lt.s32.totalorder (!%p144_p10), %v229_v27, 16 }
  0x16   : > { %s172_s23 = scalar_select %p171_p11, %s494_s12, 1 }
  0x17   : > { %v232_v33 = vld [vmem:[#allocation2] sm:$0xff]  ;;  %s506_s12 = smov [#allocation3]  }
  0x18   : > { %s351_s24 = sshll.u32 %s172_s23, 3  ;;  %s253_s23 = scalar_lea.sflag [#allocation4], %s167_s4 }
  0x19   : > { %s174_s27 = scalar_lea.vmem %s645_s0, %s351_s24  ;;  %s180_s30 = scalar_lea.vmem %s646_s1, %s351_s24 }
  0x1a   : > { %v188_v1 = vld [vmem:[%s174_s27] sm:$0xff]  ;;  %s424_s24 = scalar_lea.vmem %s595_s7, 128  ;;  %s428_s25 = sshll.u32 %s506_s12, 4  ;;  %s429_s25 = int_to_ptr.vmem [resolvable:$false] %s428_s25 }
  0x1b   : > { %v191_v2 = vsel %vm190_vm0, %v188_v1, -inf  ;;  %v189_v3 = vld [vmem:[%s180_s30] sm:$0xff]  ;;  %p425_p12 = scmp.ne.s32.totalorder %s595_s7, %s424_s24  ;;  %s430_s26 = scalar_lea.vmem %s429_s25, 256 }
  0x1c   : > { %192 = vmax.xlane.f32.xlu0 %v191_v2  ;;  %p431_p1 = scmp.lt.s32.totalorder %s595_s7, %s429_s25  ;;  %p432_p2 = scmp.lt.s32.totalorder %s430_s26, %s424_s24 }
  0x1d   : > { %p426_p13 = pnand %p425_p12, %p562_p4 }
  0x1e   : > { %p433_p3 = por %p432_p2, %p431_p1 }
  0x1f   : > { %p427_p0 = pneg %p426_p13 }
  0x21   : > { %p434_p5 = pnand %p433_p3, %p427_p0 }
  0x32   : > { %203 = vperm.xlu0 %417, %v189_v3  }
  0xa9   : > { %v193_v4 = vpop.xlane.xlu0 %192 }
  0xaa   : > { %v194_v5 = vsub.f32 %v188_v1, %v193_v4 }
  0xac   : > { %v195_v6 = vmul.f32 1.442695, %v194_v5 }
  0xae   : > { %418 = vpow2.f32 %v195_v6 }
  0xb1   : > { %v204_v9 = vpop.permute.xlu0 %203 }
  0xb2   : > { %vm205_vm1 = vcmp.eq.s32.totalorder %v201_v8, %v204_v9 }
  0xb3   : > { %v206_v13 = vsel %vm205_vm1, %v188_v1, 0.0 }
  0xb4   : > { %v207_v15 = vsel %vm190_vm0, %v206_v13, 0.0 }
  0xb8   : > { %v419_v10 = vpop.eup %418 }
  0xb9   : > { %v197_v11 = vsel %vm190_vm0, %v419_v10, 0.0  ;;  %v210_v12 = vsel %vm205_vm1, %v419_v10, 0.0 }
  0xba   : > { %198 = vadd.xlane.f32.xlu1 %v197_v11  ;;  %v211_v14 = vsel %vm190_vm0, %v210_v12, 0.0 }
  0xbe   : > { %212 = vadd.xlane.f32.xlu1 %v211_v14 }
  0xc2   : > { %208 = vadd.xlane.f32.xlu1 %v207_v15 }
 0x147   : > { %v199_v17 = vpop.xlane.xlu1 %198 }
 0x148   : > { %420 = vlog2.f32 %v199_v17 }
 0x149   : > { %422 = vrcp.f32 %v199_v17 }
 0x14b   : > { %v213_v18 = vpop.xlane.xlu1 %212 }
 0x14f   : > { %v209_v24 = vpop.xlane.xlu1 %208 }
 0x150   : > { %v216_v29 = vsub.f32 %v209_v24, %v193_v4 }
 0x152   : > { %v421_v19 = vpop.eup %420 }
 0x153   : > { %v423_v20 = vpop.eup %422  ;;  %v215_v26 = vmul.f32 0.6931472, %v421_v19 }
 0x154   : > { %v219_v22 = vmul.f32 %v423_v20, %v213_v18 }
 0x155   : > { %v217_v31 = vsub.f32 %v215_v26, %v216_v29 }
 0x156   : > { %v220_v25 = vsub.f32 1.0, %v219_v22 }
 0x158   : > { %v221_v28 = vmax.f32 %v220_v25, 0.0 }
 0x15a   : > { %v222_v30 = vmul.f32 %v221_v28, %v221_v28 }
 0x15c   : > { %v223_v32 = vmul.f32 %v222_v30, %v217_v31 }
 0x15e   : > { %v231_v34 = vsel %vm230_vm3, %v223_v32, 0.0 }
 0x15f   : > { %v233_v35 = vadd.f32 %v232_v33, %v231_v34 }
 0x161   : > { %235 = vst.msk [vmem:[#allocation2] sm:$0xff] %vm186_vm2, %v233_v35 }
 0x168   : > { %v239_v36 = vld [vmem:[#allocation2] sm:$0xff] }
 0x169   : > { %v240_v37 = vsel %vm186_vm2, %v239_v36, 0.0 }
 0x16a   : > { %241 = vadd.xlane.f32.xlu1 %v240_v37 }
 0x1f7   : > { %v242_v38 = vpop.xlane.xlu1 %241 }
 0x1f8   : > { %v243_v39 = vrot.slane %v242_v38, 4 }
 0x1fa   : > { %v244_v40 = vadd.f32 %v243_v39, %v242_v38 }
 0x1fc   : > { %v245_v41 = vrot.slane %v244_v40, 2 }
 0x1fe   : > { %v246_v42 = vadd.f32 %v245_v41, %v244_v40 }
 0x200   : > { %v247_v43 = vrot.slane %v246_v42, 1 }
 0x202   : > { %v248_v44 = vadd.f32 %v247_v43, %v246_v42 }
 0x204   : > { %358 = vpush %v248_v44 }
 0x235   : > { %s359_s15 = spop %358 }
 0x236   : > { %v250_v45 = vstv %s359_s15 }
 0x237   : > { %251 = vst [vmem:[%s169_s6] sm:$0xff] %v250_v45 }
 0x238   : > { %437 = shalt.err (!%p434_p5)
}
 0x239   : > { %s438_s27 = scalar_lea.hbm %s600_s20, 128  ;;  %s442_s30 = scalar_lea.hbm %s647_s2, 256 }
 0x23a   : > { %p439_p6 = scmp.ne.s32.totalorder %s600_s20, %s438_s27  ;;  %p443_p10 = scmp.lt.u32.totalorder %s600_s20, %s647_s2 }
 0x23b   : > { %p444_p11 = scmp.lt.u32.totalorder %s442_s30, %s438_s27  ;;  %p446_p13 = scmp.lt.u32.totalorder %s438_s27, %s600_s20 }
 0x23c   : > { %p440_p7 = pnand %p439_p6, %p562_p4 }
 0x23d   : > { %p445_p12 = por %p444_p11, %p443_p10 }
 0x23e   : > { %p441_p9 = pneg %p440_p7 }
 0x23f   : > { %p447_p0 = por %p446_p13, %p445_p12 }
 0x241   : > { %p448_p1 = pnand %p447_p0, %p441_p9 }
 0x243   : > { %451 = shalt.err (!%p448_p1)
}
 0x244   : > { %360 = dma.vmem_to_hbm [thread:$0]  (%p562_p4), %s595_s7, 128, %s600_s20, %s253_s23  }
 0x245 PF: > { %p366_p2 = scmp.ge.s32.totalorder %s502_s14, 2  ;;  %s278_s5 = sand.u32 1, %s482_s9  }
 0x246   : > { %s279_s6 = scalar_lea.sflag [#allocation4], %s278_s5 }
 0x247   : > { %p363_p3 = pnand %p366_p2, %p569_p8 }
 0x249   : > { %477 = dma.done.wait (!%p363_p3), %s279_s6, 128  }
 0x24a   : > { %479 = vsyncadd (!%p363_p3), %s279_s6, 4294967168  ;;  %s15_s14 = sadd.s32 1, %s502_s14   ;;  %s650_s9 = smov %s486_s10 }
 0x24b   : > { %p12_p5 = scmp.ge.s32.totalorder %s15_s14, 4   ;;  %s651_s10 = smov %s490_s11 }
 0x24c   : > { %s652_s11 = smov %s575_s22  ;;  %s653_s12 = smov %s498_s13 }
 0x24d   : > { %s654_s13 = smov %s656_s17  ;;  %14 = sbr.rel (!%p12_p5) target bundleno = 4 (0x4), region = 74 }
 0x254   :  { %284 = vsyncpa [#allocation4], 1 }
 0x255   :  { %286 = vsyncpa [#allocation4 + $0x1], 1 }

</bundles_post_ra>
